<compile_context>
chip_gen: v7x
topology: tpu7x:2x2x1
jax: 0.10.0
libtpu: 0.0.40
codegen_flags: <defaults>
</compile_context>

<pallas_src>
import functools
import math

import jax
import jax.numpy as jnp
from jax import lax
from jax.experimental import pallas as pl
from jax.experimental.pallas import tpu as pltpu


# --------------------------------------------------------------------------------------
# Pallas kernel
# --------------------------------------------------------------------------------------
def _wavenet_kernel(x_ref, mask_ref, w_in_ref, b_in_ref, w_rs_ref, b_rs_ref, out_ref,
                    *, dilations, kernel_size, pad_left, pad_right):
    """Fused WaveNet forward for ONE batch element (time-in-lanes layout).

    x_ref:    [C, T]          input activations
    mask_ref: [1, T]          un-broadcast mask
    w_in_ref: [L, 2C, K*C]    dilated-conv weights, taps folded into the contraction dim
    b_in_ref: [L, 2C, 1]      dilated-conv biases
    w_rs_ref: [L, 2C, C]      1x1 residual/skip conv weights
    b_rs_ref: [L, 2C, 1]      1x1 conv biases
    out_ref:  [C, T]          summed (masked) skip connections
    """
    C, T = x_ref.shape
    K = kernel_size
    half = (K - 1) // 2
    Tp = pad_left + T + pad_right
    mm_dtype = w_in_ref.dtype

    def pad_time(a):
        parts = []
        if pad_left:
            parts.append(jnp.zeros((a.shape[0], pad_left), jnp.float32))
        parts.append(a)
        if pad_right:
            parts.append(jnp.zeros((a.shape[0], pad_right), jnp.float32))
        return parts[0] if len(parts) == 1 else jnp.concatenate(parts, axis=1)

    # Zero-halo'd working tensors, built ONCE per grid step. The halo columns of `xp`
    # stay exactly zero across layers because the residual update multiplies by `mask`
    # (zero in the halo), so every dilated tap reads correct "same"-conv zero padding.
    xp = pad_time(x_ref[...].astype(jnp.float32))                                # [C, Tp]
    mask = jnp.broadcast_to(pad_time(mask_ref[...].astype(jnp.float32)), (C, Tp))
    skips = jnp.zeros((C, Tp), jnp.float32)

    # TODO(synk): for deep stacks (10+ layers) switch this Python unroll to a
    # lax.fori_loop over the stacked per-layer weights with a dynamic pltpu.roll shift.
    for l, dil in enumerate(dilations):
        # K shifted time views via XLU rotates: tap_k[t] = xp[t + (k - half)*dil].
        # Wrap-around only touches the halo, whose outputs are discarded / re-zeroed.
        taps = []
        for k in range(K):
            s = (k - half) * dil
            taps.append(xp if s == 0 else pltpu.roll(xp, (-s) % Tp, axis=1))
        lhs = jnp.concatenate(taps, axis=0).astype(mm_dtype)                    # [K*C, Tp]

        # Dilated conv C -> 2C as ONE matmul with contraction depth K*C.
        gates = jnp.dot(w_in_ref[l], lhs,
                        preferred_element_type=jnp.float32) + b_in_ref[l]       # [2C, Tp]

        # Gated activation (EUP tanh/sigmoid + VPU multiply); clean sublane split at C.
        acts = jnp.tanh(gates[:C]) * jax.nn.sigmoid(gates[C:])                  # [C, Tp]
        # Dropout: eval-mode no-op (dropout_rate=0.0 default).

        # 1x1 conv C -> 2C: first C rows = residuals, last C rows = skips.
        rs = jnp.dot(w_rs_ref[l], acts.astype(mm_dtype),
                     preferred_element_type=jnp.float32) + b_rs_ref[l]          # [2C, Tp]
        xp = (xp + rs[:C]) * mask
        skips = skips + rs[C:]

    out_ref[...] = (skips * mask)[:, pad_left:pad_left + T]


# --------------------------------------------------------------------------------------
# Wrapper / parameter packing
# --------------------------------------------------------------------------------------
def _round_up(n, m):
    return ((n + m - 1) // m) * m


def pack_params(layers, *, matmul_dtype=jnp.bfloat16):
    """One-time repack of torch-layout conv weights into the folded kernel layout."""
    # torch w_in: [2C, C, K] -> [2C, K, C] -> [2C, K*C]  (row index = k*C + c)
    w_in = jnp.stack([
        jnp.transpose(l["w_in"], (0, 2, 1)).reshape(l["w_in"].shape[0], -1)
        for l in layers]).astype(matmul_dtype)                       # [L, 2C, K*C]
    b_in = jnp.stack([l["b_in"].reshape(-1, 1) for l in layers]).astype(jnp.float32)
    w_rs = jnp.stack([l["w_rs"][:, :, 0] for l in layers]).astype(matmul_dtype)  # [L,2C,C]
    b_rs = jnp.stack([l["b_rs"].reshape(-1, 1) for l in layers]).astype(jnp.float32)
    return w_in, b_in, w_rs, b_rs


def wavenet_forward(packed, x, masks, *, conv_stack, kernel_size, dilation_rate):
    """x: [B, C, T], masks: [B, 1, T] -> skips: [B, C, T]."""
    assert kernel_size % 2 == 1, "'same' dilated conv requires odd kernel_size"
    B, C, T = x.shape
    w_in, b_in, w_rs, b_rs = packed
    L = conv_stack
    K = kernel_size
    dilations = tuple(dilation_rate ** i for i in range(L))
    half = (K - 1) // 2
    halo = half * max(dilations) if L else 0

    pad_left = halo
    Tp = _round_up(pad_left + T + halo, 128)        # lane-aligned padded time axis
    pad_right = Tp - pad_left - T

    kernel = functools.partial(_wavenet_kernel, dilations=dilations, kernel_size=K,
                               pad_left=pad_left, pad_right=pad_right)

    out = pl.pallas_call(
        kernel,
        grid=(B,),
        out_shape=jax.ShapeDtypeStruct((B, C, T), jnp.float32),
        in_specs=[
            pl.BlockSpec((None, C, T), lambda b: (b, 0, 0)),        # x (one batch/step)
            pl.BlockSpec((None, 1, T), lambda b: (b, 0, 0)),        # mask, un-broadcast
            pl.BlockSpec((L, 2 * C, K * C), lambda b: (0, 0, 0)),   # folded conv weights
            pl.BlockSpec((L, 2 * C, 1), lambda b: (0, 0, 0)),
            pl.BlockSpec((L, 2 * C, C), lambda b: (0, 0, 0)),       # 1x1 conv weights
            pl.BlockSpec((L, 2 * C, 1), lambda b: (0, 0, 0)),
        ],
        out_specs=pl.BlockSpec((None, C, T), lambda b: (b, 0, 0)),
        compiler_params=pltpu.CompilerParams(
            dimension_semantics=("parallel",),
            vmem_limit_bytes=48 * 1024 * 1024,
        ),
    )(x.astype(jnp.float32), masks.astype(jnp.float32), w_in, b_in, w_rs, b_rs)
    # TODO(synk): for very long T, additionally tile the time axis with a
    # receptive-field halo (manual overlapping DMA) instead of one [C, Tp] tile per batch.
    return out


# --------------------------------------------------------------------------------------
# Deterministic parameter init (shapes match torch Conv1d(C, 2C, K) / Conv1d(C, 2C, 1))
# --------------------------------------------------------------------------------------
def init_params(key, channels, conv_stack, kernel_size):
    C = channels
    layers = []
    for _ in range(conv_stack):
        key, k1, k2, k3, k4 = jax.random.split(key, 5)
        bi = 1.0 / math.sqrt(C * kernel_size)
        br = 1.0 / math.sqrt(C)
        layers.append({
            "w_in": jax.random.uniform(k1, (2 * C, C, kernel_size), jnp.float32, -bi, bi),
            "b_in": jax.random.uniform(k2, (2 * C,), jnp.float32, -bi, bi),
            "w_rs": jax.random.uniform(k3, (2 * C, C, 1), jnp.float32, -br, br),
            "b_rs": jax.random.uniform(k4, (2 * C,), jnp.float32, -br, br),
        })
    return layers


# --------------------------------------------------------------------------------------
# Pure-JAX reference (torch-equivalent convs) for correctness checks
# --------------------------------------------------------------------------------------
def reference_forward(layers, x, masks, *, kernel_size, dilation_rate):
    C = x.shape[1]
    skips_sum = None
    for i, layer in enumerate(layers):
        dilation = dilation_rate ** i
        padding = (kernel_size - 1) * dilation // 2
        ins = lax.conv_general_dilated(
            x, layer["w_in"], window_strides=(1,), padding=[(padding, padding)],
            rhs_dilation=(dilation,), dimension_numbers=("NCH", "OIH", "NCH"),
            precision=lax.Precision.HIGHEST,
        ) + layer["b_in"][None, :, None]
        acts = jnp.tanh(ins[:, :C]) * jax.nn.sigmoid(ins[:, C:])
        rs = lax.conv_general_dilated(
            acts, layer["w_rs"], window_strides=(1,), padding=[(0, 0)],
            dimension_numbers=("NCH", "OIH", "NCH"),
            precision=lax.Precision.HIGHEST,
        ) + layer["b_rs"][None, :, None]
        x = (x + rs[:, :C]) * masks
        skips_sum = rs[:, C:] if skips_sum is None else skips_sum + rs[:, C:]
    return skips_sum * masks


# --------------------------------------------------------------------------------------
if __name__ == "__main__":
    CALC_CHANNELS = 32
    CONV_STACK = 3
    KERNEL_SIZE = 3
    DILATION_RATE = 2
    B, T = 2, 64

    key = jax.random.PRNGKey(0)
    kx, kp = jax.random.split(key)
    x = jax.random.normal(kx, (B, CALC_CHANNELS, T), jnp.float32)
    lengths = jnp.array([T, T - 16], jnp.int32)
    masks = (jnp.arange(T)[None, :] < lengths[:, None]).astype(jnp.float32)[:, None, :]

    layers = init_params(kp, CALC_CHANNELS, CONV_STACK, KERNEL_SIZE)
    ref = reference_forward(layers, x, masks, kernel_size=KERNEL_SIZE,
                            dilation_rate=DILATION_RATE)

    # f32 MXU-input path: tight tolerance against the f32 reference.
    packed_f32 = pack_params(layers, matmul_dtype=jnp.float32)
    out_f32 = wavenet_forward(packed_f32, x, masks, conv_stack=CONV_STACK,
                              kernel_size=KERNEL_SIZE, dilation_rate=DILATION_RATE)
    out_f32 = jax.block_until_ready(out_f32)
    assert out_f32.shape == (B, CALC_CHANNELS, T), out_f32.shape
    err32 = float(jnp.abs(out_f32 - ref).max())
    assert jnp.allclose(out_f32, ref, atol=1e-3, rtol=1e-3), err32

    # bf16 MXU-input path (f32 accumulation / residual / skips): looser tolerance.
    packed_bf16 = pack_params(layers, matmul_dtype=jnp.bfloat16)
    out_bf16 = wavenet_forward(packed_bf16, x, masks, conv_stack=CONV_STACK,
                               kernel_size=KERNEL_SIZE, dilation_rate=DILATION_RATE)
    out_bf16 = jax.block_until_ready(out_bf16)
    err16 = float(jnp.abs(out_bf16 - ref).max())
    assert jnp.allclose(out_bf16, ref, atol=5e-2, rtol=5e-2), err16

    print("KERNEL_OK")
</pallas_src>

<mosaic_0001>
module attributes {stable_mosaic.version = 11 : i64} {
  func.func @_wavenet_kernel(%arg0: i32, %arg1: memref<1x32x64xf32, #tpu.memory_space<vmem>>, %arg2: memref<1x1x64xf32, #tpu.memory_space<vmem>>, %arg3: memref<3x64x96xf32, #tpu.memory_space<vmem>>, %arg4: memref<3x64x1xf32, #tpu.memory_space<vmem>>, %arg5: memref<3x64x32xf32, #tpu.memory_space<vmem>>, %arg6: memref<3x64x1xf32, #tpu.memory_space<vmem>>, %arg7: memref<1x32x64xf32, #tpu.memory_space<vmem>>) attributes {dimension_semantics = [#tpu.dimension_semantics<parallel>], iteration_bounds = array<i64: 2>, scalar_prefetch = 0 : i64, scratch_operands = 0 : i64, tpu.core_type = #tpu.core_type<tc>, window_params = [{transform_indices = @transform_0, window_bounds = array<i64: 1, 32, 64>}, {transform_indices = @transform_1, window_bounds = array<i64: 1, 1, 64>}, {pipeline_mode = #tpu.pipeline_mode<synchronous>, transform_indices = @transform_2, window_bounds = array<i64: 3, 64, 96>}, {pipeline_mode = #tpu.pipeline_mode<synchronous>, transform_indices = @transform_3, window_bounds = array<i64: 3, 64, 1>}, {pipeline_mode = #tpu.pipeline_mode<synchronous>, transform_indices = @transform_4, window_bounds = array<i64: 3, 64, 32>}, {pipeline_mode = #tpu.pipeline_mode<synchronous>, transform_indices = @transform_5, window_bounds = array<i64: 3, 64, 1>}, {transform_indices = @transform_6, window_bounds = array<i64: 1, 32, 64>}]} {
    %c0 = arith.constant 0 : index
    %c0_0 = arith.constant 0 : index
    %c0_1 = arith.constant 0 : index
    %0 = vector.load %arg1[%c0, %c0_0, %c0_1] : memref<1x32x64xf32, #tpu.memory_space<vmem>>, vector<1x32x64xf32>
    %1 = vector.shape_cast %0 : vector<1x32x64xf32> to vector<32x64xf32>
    %cst = arith.constant 0.000000e+00 : f32
    %2 = vector.broadcast %cst : f32 to vector<32x4xf32>
    %cst_2 = arith.constant 0.000000e+00 : f32
    %3 = vector.broadcast %cst_2 : f32 to vector<32x60xf32>
    %4 = tpu.concatenate %2, %1, %3 in 1 : vector<32x4xf32>, vector<32x64xf32>, vector<32x60xf32> -> vector<32x128xf32>
    %c0_3 = arith.constant 0 : index
    %c0_4 = arith.constant 0 : index
    %c0_5 = arith.constant 0 : index
    %5 = vector.load %arg2[%c0_3, %c0_4, %c0_5] : memref<1x1x64xf32, #tpu.memory_space<vmem>>, vector<1x1x64xf32>
    %6 = vector.shape_cast %5 : vector<1x1x64xf32> to vector<1x64xf32>
    %cst_6 = arith.constant 0.000000e+00 : f32
    %7 = vector.broadcast %cst_6 : f32 to vector<1x4xf32>
    %cst_7 = arith.constant 0.000000e+00 : f32
    %8 = vector.broadcast %cst_7 : f32 to vector<1x60xf32>
    %9 = tpu.concatenate %7, %6, %8 in 1 : vector<1x4xf32>, vector<1x64xf32>, vector<1x60xf32> -> vector<1x128xf32>
    %10 = vector.shape_cast %9 : vector<1x128xf32> to vector<1x128xf32>
    %11 = vector.broadcast %10 : vector<1x128xf32> to vector<32x128xf32>
    %cst_8 = arith.constant 0.000000e+00 : f32
    %12 = vector.broadcast %cst_8 : f32 to vector<32x128xf32>
    %c1_i32 = arith.constant 1 : i32
    %13 = tpu.dynamic_rotate %4 by %c1_i32 dim 1 : vector<32x128xf32>, i32 -> vector<32x128xf32>
    %c127_i32 = arith.constant 127 : i32
    %14 = tpu.dynamic_rotate %4 by %c127_i32 dim 1 : vector<32x128xf32>, i32 -> vector<32x128xf32>
    %15 = tpu.concatenate %13, %4, %14 in 0 : vector<32x128xf32>, vector<32x128xf32>, vector<32x128xf32> -> vector<96x128xf32>
    %c0_9 = arith.constant 0 : index
    %c0_10 = arith.constant 0 : index
    %c0_11 = arith.constant 0 : index
    %16 = vector.load %arg3[%c0_9, %c0_10, %c0_11] : memref<3x64x96xf32, #tpu.memory_space<vmem>>, vector<1x64x96xf32>
    %17 = vector.shape_cast %16 : vector<1x64x96xf32> to vector<64x96xf32>
    %cst_12 = arith.constant dense<0.000000e+00> : vector<64x128xf32>
    %18 = tpu.matmul %17, %15, %cst_12 {dimension_numbers = #tpu.dot_dimension_numbers<[1], [0], [0], [1], [0, 0, 1, 1], [], []>} : vector<64x96xf32>, vector<96x128xf32>, vector<64x128xf32> -> vector<64x128xf32>
    %c0_13 = arith.constant 0 : index
    %c0_14 = arith.constant 0 : index
    %c0_15 = arith.constant 0 : index
    %19 = vector.load %arg4[%c0_13, %c0_14, %c0_15] : memref<3x64x1xf32, #tpu.memory_space<vmem>>, vector<1x64x1xf32>
    %20 = vector.shape_cast %19 : vector<1x64x1xf32> to vector<64x1xf32>
    %21 = vector.broadcast %20 : vector<64x1xf32> to vector<64x128xf32>
    %22 = arith.addf %18, %21 : vector<64x128xf32>
    %23 = vector.extract_strided_slice %22 {offsets = [0, 0], sizes = [32, 128], strides = [1, 1]} : vector<64x128xf32> to vector<32x128xf32>
    %24 = math.tanh %23 : vector<32x128xf32>
    %25 = vector.extract_strided_slice %22 {offsets = [32, 0], sizes = [32, 128], strides = [1, 1]} : vector<64x128xf32> to vector<32x128xf32>
    %26 = arith.negf %25 : vector<32x128xf32>
    %27 = math.exp %26 : vector<32x128xf32>
    %cst_16 = arith.constant 1.000000e+00 : f32
    %28 = vector.broadcast %cst_16 : f32 to vector<32x128xf32>
    %29 = arith.addf %28, %27 : vector<32x128xf32>
    %30 = arith.divf %28, %29 : vector<32x128xf32>
    %31 = arith.mulf %24, %30 : vector<32x128xf32>
    %c0_17 = arith.constant 0 : index
    %c0_18 = arith.constant 0 : index
    %c0_19 = arith.constant 0 : index
    %32 = vector.load %arg5[%c0_17, %c0_18, %c0_19] : memref<3x64x32xf32, #tpu.memory_space<vmem>>, vector<1x64x32xf32>
    %33 = vector.shape_cast %32 : vector<1x64x32xf32> to vector<64x32xf32>
    %cst_20 = arith.constant dense<0.000000e+00> : vector<64x128xf32>
    %34 = tpu.matmul %33, %31, %cst_20 {dimension_numbers = #tpu.dot_dimension_numbers<[1], [0], [0], [1], [0, 0, 1, 1], [], []>} : vector<64x32xf32>, vector<32x128xf32>, vector<64x128xf32> -> vector<64x128xf32>
    %c0_21 = arith.constant 0 : index
    %c0_22 = arith.constant 0 : index
    %c0_23 = arith.constant 0 : index
    %35 = vector.load %arg6[%c0_21, %c0_22, %c0_23] : memref<3x64x1xf32, #tpu.memory_space<vmem>>, vector<1x64x1xf32>
    %36 = vector.shape_cast %35 : vector<1x64x1xf32> to vector<64x1xf32>
    %37 = vector.broadcast %36 : vector<64x1xf32> to vector<64x128xf32>
    %38 = arith.addf %34, %37 : vector<64x128xf32>
    %39 = vector.extract_strided_slice %38 {offsets = [0, 0], sizes = [32, 128], strides = [1, 1]} : vector<64x128xf32> to vector<32x128xf32>
    %40 = arith.addf %4, %39 : vector<32x128xf32>
    %41 = arith.mulf %40, %11 : vector<32x128xf32>
    %42 = vector.extract_strided_slice %38 {offsets = [32, 0], sizes = [32, 128], strides = [1, 1]} : vector<64x128xf32> to vector<32x128xf32>
    %43 = arith.addf %12, %42 : vector<32x128xf32>
    %c2_i32 = arith.constant 2 : i32
    %44 = tpu.dynamic_rotate %41 by %c2_i32 dim 1 : vector<32x128xf32>, i32 -> vector<32x128xf32>
    %c126_i32 = arith.constant 126 : i32
    %45 = tpu.dynamic_rotate %41 by %c126_i32 dim 1 : vector<32x128xf32>, i32 -> vector<32x128xf32>
    %46 = tpu.concatenate %44, %41, %45 in 0 : vector<32x128xf32>, vector<32x128xf32>, vector<32x128xf32> -> vector<96x128xf32>
    %c1 = arith.constant 1 : index
    %c0_24 = arith.constant 0 : index
    %c0_25 = arith.constant 0 : index
    %47 = vector.load %arg3[%c1, %c0_24, %c0_25] : memref<3x64x96xf32, #tpu.memory_space<vmem>>, vector<1x64x96xf32>
    %48 = vector.shape_cast %47 : vector<1x64x96xf32> to vector<64x96xf32>
    %cst_26 = arith.constant dense<0.000000e+00> : vector<64x128xf32>
    %49 = tpu.matmul %48, %46, %cst_26 {dimension_numbers = #tpu.dot_dimension_numbers<[1], [0], [0], [1], [0, 0, 1, 1], [], []>} : vector<64x96xf32>, vector<96x128xf32>, vector<64x128xf32> -> vector<64x128xf32>
    %c1_27 = arith.constant 1 : index
    %c0_28 = arith.constant 0 : index
    %c0_29 = arith.constant 0 : index
    %50 = vector.load %arg4[%c1_27, %c0_28, %c0_29] : memref<3x64x1xf32, #tpu.memory_space<vmem>>, vector<1x64x1xf32>
    %51 = vector.shape_cast %50 : vector<1x64x1xf32> to vector<64x1xf32>
    %52 = vector.broadcast %51 : vector<64x1xf32> to vector<64x128xf32>
    %53 = arith.addf %49, %52 : vector<64x128xf32>
    %54 = vector.extract_strided_slice %53 {offsets = [0, 0], sizes = [32, 128], strides = [1, 1]} : vector<64x128xf32> to vector<32x128xf32>
    %55 = math.tanh %54 : vector<32x128xf32>
    %56 = vector.extract_strided_slice %53 {offsets = [32, 0], sizes = [32, 128], strides = [1, 1]} : vector<64x128xf32> to vector<32x128xf32>
    %57 = arith.negf %56 : vector<32x128xf32>
    %58 = math.exp %57 : vector<32x128xf32>
    %cst_30 = arith.constant 1.000000e+00 : f32
    %59 = vector.broadcast %cst_30 : f32 to vector<32x128xf32>
    %60 = arith.addf %59, %58 : vector<32x128xf32>
    %61 = arith.divf %59, %60 : vector<32x128xf32>
    %62 = arith.mulf %55, %61 : vector<32x128xf32>
    %c1_31 = arith.constant 1 : index
    %c0_32 = arith.constant 0 : index
    %c0_33 = arith.constant 0 : index
    %63 = vector.load %arg5[%c1_31, %c0_32, %c0_33] : memref<3x64x32xf32, #tpu.memory_space<vmem>>, vector<1x64x32xf32>
    %64 = vector.shape_cast %63 : vector<1x64x32xf32> to vector<64x32xf32>
    %cst_34 = arith.constant dense<0.000000e+00> : vector<64x128xf32>
    %65 = tpu.matmul %64, %62, %cst_34 {dimension_numbers = #tpu.dot_dimension_numbers<[1], [0], [0], [1], [0, 0, 1, 1], [], []>} : vector<64x32xf32>, vector<32x128xf32>, vector<64x128xf32> -> vector<64x128xf32>
    %c1_35 = arith.constant 1 : index
    %c0_36 = arith.constant 0 : index
    %c0_37 = arith.constant 0 : index
    %66 = vector.load %arg6[%c1_35, %c0_36, %c0_37] : memref<3x64x1xf32, #tpu.memory_space<vmem>>, vector<1x64x1xf32>
    %67 = vector.shape_cast %66 : vector<1x64x1xf32> to vector<64x1xf32>
    %68 = vector.broadcast %67 : vector<64x1xf32> to vector<64x128xf32>
    %69 = arith.addf %65, %68 : vector<64x128xf32>
    %70 = vector.extract_strided_slice %69 {offsets = [0, 0], sizes = [32, 128], strides = [1, 1]} : vector<64x128xf32> to vector<32x128xf32>
    %71 = arith.addf %41, %70 : vector<32x128xf32>
    %72 = arith.mulf %71, %11 : vector<32x128xf32>
    %73 = vector.extract_strided_slice %69 {offsets = [32, 0], sizes = [32, 128], strides = [1, 1]} : vector<64x128xf32> to vector<32x128xf32>
    %74 = arith.addf %43, %73 : vector<32x128xf32>
    %c4_i32 = arith.constant 4 : i32
    %75 = tpu.dynamic_rotate %72 by %c4_i32 dim 1 : vector<32x128xf32>, i32 -> vector<32x128xf32>
    %c124_i32 = arith.constant 124 : i32
    %76 = tpu.dynamic_rotate %72 by %c124_i32 dim 1 : vector<32x128xf32>, i32 -> vector<32x128xf32>
    %77 = tpu.concatenate %75, %72, %76 in 0 : vector<32x128xf32>, vector<32x128xf32>, vector<32x128xf32> -> vector<96x128xf32>
    %c2 = arith.constant 2 : index
    %c0_38 = arith.constant 0 : index
    %c0_39 = arith.constant 0 : index
    %78 = vector.load %arg3[%c2, %c0_38, %c0_39] : memref<3x64x96xf32, #tpu.memory_space<vmem>>, vector<1x64x96xf32>
    %79 = vector.shape_cast %78 : vector<1x64x96xf32> to vector<64x96xf32>
    %cst_40 = arith.constant dense<0.000000e+00> : vector<64x128xf32>
    %80 = tpu.matmul %79, %77, %cst_40 {dimension_numbers = #tpu.dot_dimension_numbers<[1], [0], [0], [1], [0, 0, 1, 1], [], []>} : vector<64x96xf32>, vector<96x128xf32>, vector<64x128xf32> -> vector<64x128xf32>
    %c2_41 = arith.constant 2 : index
    %c0_42 = arith.constant 0 : index
    %c0_43 = arith.constant 0 : index
    %81 = vector.load %arg4[%c2_41, %c0_42, %c0_43] : memref<3x64x1xf32, #tpu.memory_space<vmem>>, vector<1x64x1xf32>
    %82 = vector.shape_cast %81 : vector<1x64x1xf32> to vector<64x1xf32>
    %83 = vector.broadcast %82 : vector<64x1xf32> to vector<64x128xf32>
    %84 = arith.addf %80, %83 : vector<64x128xf32>
    %85 = vector.extract_strided_slice %84 {offsets = [0, 0], sizes = [32, 128], strides = [1, 1]} : vector<64x128xf32> to vector<32x128xf32>
    %86 = math.tanh %85 : vector<32x128xf32>
    %87 = vector.extract_strided_slice %84 {offsets = [32, 0], sizes = [32, 128], strides = [1, 1]} : vector<64x128xf32> to vector<32x128xf32>
    %88 = arith.negf %87 : vector<32x128xf32>
    %89 = math.exp %88 : vector<32x128xf32>
    %cst_44 = arith.constant 1.000000e+00 : f32
    %90 = vector.broadcast %cst_44 : f32 to vector<32x128xf32>
    %91 = arith.addf %90, %89 : vector<32x128xf32>
    %92 = arith.divf %90, %91 : vector<32x128xf32>
    %93 = arith.mulf %86, %92 : vector<32x128xf32>
    %c2_45 = arith.constant 2 : index
    %c0_46 = arith.constant 0 : index
    %c0_47 = arith.constant 0 : index
    %94 = vector.load %arg5[%c2_45, %c0_46, %c0_47] : memref<3x64x32xf32, #tpu.memory_space<vmem>>, vector<1x64x32xf32>
    %95 = vector.shape_cast %94 : vector<1x64x32xf32> to vector<64x32xf32>
    %cst_48 = arith.constant dense<0.000000e+00> : vector<64x128xf32>
    %96 = tpu.matmul %95, %93, %cst_48 {dimension_numbers = #tpu.dot_dimension_numbers<[1], [0], [0], [1], [0, 0, 1, 1], [], []>} : vector<64x32xf32>, vector<32x128xf32>, vector<64x128xf32> -> vector<64x128xf32>
    %c2_49 = arith.constant 2 : index
    %c0_50 = arith.constant 0 : index
    %c0_51 = arith.constant 0 : index
    %97 = vector.load %arg6[%c2_49, %c0_50, %c0_51] : memref<3x64x1xf32, #tpu.memory_space<vmem>>, vector<1x64x1xf32>
    %98 = vector.shape_cast %97 : vector<1x64x1xf32> to vector<64x1xf32>
    %99 = vector.broadcast %98 : vector<64x1xf32> to vector<64x128xf32>
    %100 = arith.addf %96, %99 : vector<64x128xf32>
    %101 = vector.extract_strided_slice %100 {offsets = [32, 0], sizes = [32, 128], strides = [1, 1]} : vector<64x128xf32> to vector<32x128xf32>
    %102 = arith.addf %74, %101 : vector<32x128xf32>
    %103 = arith.mulf %102, %11 : vector<32x128xf32>
    %104 = vector.extract_strided_slice %103 {offsets = [0, 4], sizes = [32, 64], strides = [1, 1]} : vector<32x128xf32> to vector<32x64xf32>
    %c0_52 = arith.constant 0 : index
    %c0_53 = arith.constant 0 : index
    %c0_54 = arith.constant 0 : index
    %105 = vector.load %arg7[%c0_52, %c0_53, %c0_54] : memref<1x32x64xf32, #tpu.memory_space<vmem>>, vector<1x32x64xf32>
    %106 = vector.shape_cast %105 : vector<1x32x64xf32> to vector<32x64xf32>
    %107 = vector.shape_cast %104 : vector<32x64xf32> to vector<1x32x64xf32>
    tpu.vector_store %arg7[%c0_52, %c0_53, %c0_54], %107 {strides = array<i32>} : memref<1x32x64xf32, #tpu.memory_space<vmem>>, vector<1x32x64xf32>,
    return
  }
  func.func @transform_0(%arg0: i32) -> (i32, i32, i32) {
    %c0_i32 = arith.constant 0 : i32
    %c0_i32_0 = arith.constant 0 : i32
    %c0_i32_1 = arith.constant 0 : i32
    return %arg0, %c0_i32, %c0_i32_0 : i32, i32, i32
  }
  func.func @transform_1(%arg0: i32) -> (i32, i32, i32) {
    %c0_i32 = arith.constant 0 : i32
    %c0_i32_0 = arith.constant 0 : i32
    %c0_i32_1 = arith.constant 0 : i32
    return %arg0, %c0_i32, %c0_i32_0 : i32, i32, i32
  }
  func.func @transform_2(%arg0: i32) -> (i32, i32, i32) {
    %c0_i32 = arith.constant 0 : i32
    %c0_i32_0 = arith.constant 0 : i32
    %c0_i32_1 = arith.constant 0 : i32
    %c0_i32_2 = arith.constant 0 : i32
    return %c0_i32, %c0_i32_0, %c0_i32_1 : i32, i32, i32
  }
  func.func @transform_3(%arg0: i32) -> (i32, i32, i32) {
    %c0_i32 = arith.constant 0 : i32
    %c0_i32_0 = arith.constant 0 : i32
    %c0_i32_1 = arith.constant 0 : i32
    %c0_i32_2 = arith.constant 0 : i32
    return %c0_i32, %c0_i32_0, %c0_i32_1 : i32, i32, i32
  }
  func.func @transform_4(%arg0: i32) -> (i32, i32, i32) {
    %c0_i32 = arith.constant 0 : i32
    %c0_i32_0 = arith.constant 0 : i32
    %c0_i32_1 = arith.constant 0 : i32
    %c0_i32_2 = arith.constant 0 : i32
    return %c0_i32, %c0_i32_0, %c0_i32_1 : i32, i32, i32
  }
  func.func @transform_5(%arg0: i32) -> (i32, i32, i32) {
    %c0_i32 = arith.constant 0 : i32
    %c0_i32_0 = arith.constant 0 : i32
    %c0_i32_1 = arith.constant 0 : i32
    %c0_i32_2 = arith.constant 0 : i32
    return %c0_i32, %c0_i32_0, %c0_i32_1 : i32, i32, i32
  }
  func.func @transform_6(%arg0: i32) -> (i32, i32, i32) {
    %c0_i32 = arith.constant 0 : i32
    %c0_i32_0 = arith.constant 0 : i32
    %c0_i32_1 = arith.constant 0 : i32
    return %arg0, %c0_i32, %c0_i32_0 : i32, i32, i32
  }
}

</mosaic_0001>

<bundles_post_ra>
// kernel: tpu_custom_call.1
= control target key start
LH: loop header
LB: loop body
LE: loop exit
PB: predicated region body
PF: predicated region fallthrough
CT: control target
= control target key end

     0   :  { %11 = vsyncpa [#allocation3], 0  ;;  %s3046_s0 = inlined_call_operand.vmem [shape: f32[2,32,64], index: 0, kind: input, shape index: {}]   ;;  %s3047_s1 = inlined_call_operand.vmem [shape: f32[2,1,64], index: 1, kind: input, shape index: {}]   ;;  %s3048_s2 = inlined_call_operand.vmem [shape: f32[3,64,96], index: 2, kind: input, shape index: {}]   ;;  %s3049_s3 = inlined_call_operand.vmem [shape: f32[3,64,1], index: 3, kind: input, shape index: {}]   ;;  %s3050_s4 = inlined_call_operand.vmem [shape: f32[3,64,32], index: 4, kind: input, shape index: {}]   ;;  %s3051_s5 = inlined_call_operand.vmem [shape: f32[3,64,1], index: 5, kind: input, shape index: {}]   ;;  %s3052_s6 = inlined_call_operand.hbm [shape: f32[2,32,64], index: 6, kind: output, shape index: {}]  }
   0x1   :  { %13 = vsyncpa [#allocation3 + $0x1], 0  ;;  %s2525_s21 = smov 0   ;;  %s2527_s22 = smov 0  }
   0x2   :  { %s2529_s23 = smov 0   ;;  %s2531_s24 = smov 0  }
   0x3 LB: > { %s2546_s25 = sadd.s32 4294967295, %s2478_s24   ;;  %s1703_s26 = sadd.s32 4294967294, %s2478_s24   ;;  %s2478_s24 = sphi %s2531_s24, %s3058_s24   ;;  %s2474_s23 = sphi %s2529_s23, %s3057_s23   ;;  %s2470_s22 = sphi %s2527_s22, %s3056_s22   ;;  %s2466_s21 = sphi %s2525_s21, %s3055_s21  }
   0x4   : > { %s2550_s27 = sadd.s32 1, %s2478_s24   ;;  %s162_s28 = sadd.s32 1, %s2474_s23 }
   0x5   : > { %s159_s29 = ssub.s32 %s2478_s24, %s2550_s27  ;;  %p172_p0 = scmp.ne.s32.totalorder %s2474_s23, %s2470_s22 }
   0x6   : > { %p160_p1 = scmp.eq.s32.totalorder %s159_s29, 0  ;;  %p173_p2 = scmp.eq.s32.totalorder %s2546_s25, 1 }
   0x7   : > { %p178_p3 = scmp.ne.s32.totalorder %s2470_s22, %s2466_s21  ;;  %p179_p4 = scmp.eq.s32.totalorder %s1703_s26, 1 }
   0x8   : > { %s2561_s30 = scalar_select %p160_p1, %s2474_s23, %s162_s28  }
   0x9   : > { %p2563_p5 = por %p173_p2, %p172_p0  ;;  %p2567_p6 = por %p179_p4, %p178_p3 }
   0xa   : > { %p1706_p7 = scmp.ge.s32.totalorder %s2478_s24, 1  ;;  %p223_p8 = scmp.lt.s32.totalorder %s2478_s24, 3 }
   0xc   : > { %p224_p9 = pnand %p1706_p7, %p223_p8 }
   0xd   : > { %p256_p10 = scmp.lt.s32.totalorder (!%p224_p9), %s2546_s25, 1  ;;  %s2480_s14 = smov (!%p224_p9), 4   ;;  %vm284_vm0 = vcmask (!%p224_p9), 31744   ;;  %vm289_vm1 = vcmask (!%p224_p9), 556032   ;;  %v325_v20 = vld [vmem:[%s3048_s2] sm:$0xff] (!%p224_p9)  ;;  %vm381_vm2 = vcmask (!%p224_p9), 785408  }
   0xe   : > { %227 = sbr.rel (%p224_p9) target bundleno = 2154 (0x86a), region = 44  ;;  %s2481_s15 = smov (!%p224_p9), 1   ;;  %1966 = vmatprep.mubr.msk.f32.mxu0 (!%p224_p9), %vm381_vm2, %v325_v20  ;;  %v338_v21 = vld [vmem:[%s3049_s3 + $0x28] sm:$0xff] (!%p224_p9)  ;;  %v337_v22 = vld [vmem:[%s3049_s3 + $0x20] sm:$0xff] (!%p224_p9)  ;;  %v2483_v23 = vmov (!%p224_p9), 0   ;;  %v339_v24 = vld [vmem:[%s3049_s3 + $0x30] sm:$0xff] (!%p224_p9) }
   0xf   : > { %s2482_s16 = smov (!%p224_p9), 127   ;;  %2303 = vset.pattern.permute.xlu1 (!%p224_p9), %v2483_v23  ;;  %2302 = vset.pattern.permute.xlu0 (!%p224_p9), %v2483_v23  ;;  %v340_v25 = vld [vmem:[%s3049_s3 + $0x38] sm:$0xff] (!%p224_p9)  ;;  %v333_v26 = vld [vmem:[%s3049_s3] sm:$0xff] (!%p224_p9)  ;;  %v334_v27 = vld [vmem:[%s3049_s3 + $0x8] sm:$0xff] (!%p224_p9)  ;;  %vm599_vm4 = vcmask (!%p224_p9), 261120   ;;  %s253_s12 = sand.u32 (!%p224_p9), 1, %s2470_s22  }
  0x10   : > { %v335_v28 = vld [vmem:[%s3049_s3 + $0x10] sm:$0xff] (!%p224_p9)  ;;  %v336_v29 = vld [vmem:[%s3049_s3 + $0x18] sm:$0xff] (!%p224_p9)  ;;  %v551_v30 = vld [vmem:[%s3051_s5] sm:$0xff] (!%p224_p9)  ;;  %vm1613_vm5 = vcmask (!%p224_p9), 523264   ;;  %s1845_s18 = sshll.u32 (!%p224_p9), %s2546_s25, 9  ;;  %s3005_s26 = scalar_lea.sflag (!%p224_p9), [#allocation3], %s253_s12 }
  0x11   : > { %v552_v31 = vld [vmem:[%s3051_s5 + $0x8] sm:$0xff] (!%p224_p9)  ;;  %v553_v32 = vld [vmem:[%s3051_s5 + $0x10] sm:$0xff] (!%p224_p9)  ;;  %v554_v33 = vld [vmem:[%s3051_s5 + $0x18] sm:$0xff] (!%p224_p9) }
  0x12   : > { %vm2119_vm3 = vmpackc.low (!%p224_p9), %vm289_vm1, %vm289_vm1  ;;  %v326_v50 = vld [vmem:[%s3048_s2 + $0x8] sm:$0xff] (!%p224_p9)  ;;  %v327_v51 = vld [vmem:[%s3048_s2 + $0x10] sm:$0xff] (!%p224_p9) }
  0x13   : > { %v328_v52 = vld [vmem:[%s3048_s2 + $0x18] sm:$0xff] (!%p224_p9)  ;;  %v329_v53 = vld [vmem:[%s3048_s2 + $0x20] sm:$0xff] (!%p224_p9)  ;;  %v330_v54 = vld [vmem:[%s3048_s2 + $0x28] sm:$0xff] (!%p224_p9) }
  0x14   : > { %v331_v55 = vld [vmem:[%s3048_s2 + $0x30] sm:$0xff] (!%p224_p9)  ;;  %v332_v56 = vld [vmem:[%s3048_s2 + $0x38] sm:$0xff] (!%p224_p9)  ;;  %v543_v57 = vld [vmem:[%s3050_s4] sm:$0xff] (!%p224_p9) }
  0x15   : > { %s2575_s9 = scalar_select %p256_p10, %s2546_s25, 1  ;;  %1986 = vmatprep.mubr.msk.f32.mxu1 %vm599_vm4, %v543_v57 }
  0x17   : > { %s1844_s10 = sshll.u32 %s2575_s9, 5  ;;  %s263_s28 = scalar_lea.vmem %s3047_s1, %s2575_s9 }
  0x18   : > { %s260_s13 = scalar_lea.vmem %s3046_s0, %s1844_s10  ;;  %v1710_v58 = vld [vmem:[%s263_s28] ss:$0 sm:$0xff]  ;;  %s2487_s28 = smov [#allocation2]  }
  0x19   : > { %v266_v0 = vld [vmem:[%s260_s13 + $0x10] sm:$0xff]  ;;  %v264_v1 = vld [vmem:[%s260_s13] sm:$0xff]  ;;  %v267_v2 = vld [vmem:[%s260_s13 + $0x18] sm:$0xff]  ;;  %s2420_s9 = sshll.u32 %s2487_s28, 4  ;;  %s2421_s9 = int_to_ptr.vmem [resolvable:$false] %s2420_s9 }
  0x1a   : > { %276 = vrot.lane.b32.xlu1 %v266_v0, %s2480_s14  ;;  %272 = vrot.lane.b32.xlu0 %v264_v1, %s2480_s14  ;;  %v265_v3 = vld [vmem:[%s260_s13 + $0x8] sm:$0xff]  ;;  %s1707_s13 = sshll.u32 %s253_s12, 5 }
  0x1e   : > { %278 = vrot.lane.b32.xlu1 %v267_v2, %s2480_s14  ;;  %274 = vrot.lane.b32.xlu0 %v265_v3, %s2480_s14 }
  0x8c   : > { %v277_v4 = vpop.permute.xlu1 %276  ;;  %v273_v5 = vpop.permute.xlu0 %272 }
  0x8d   : > { %v287_v6 = vsel %vm284_vm0, 0.0, %v277_v4  ;;  %v285_v7 = vsel %vm284_vm0, 0.0, %v273_v5 }
  0x8e   : > { %v2588_v8 = vsel %vm289_vm1, %v287_v6, 0.0  ;;  %v2591_v11 = vsel %vm289_vm1, %v285_v7, 0.0 }
  0x90   : > { %v279_v9 = vpop.permute.xlu1 %278  ;;  %v275_v10 = vpop.permute.xlu0 %274 }
  0x91   : > { %v288_v12 = vsel %vm284_vm0, 0.0, %v279_v9  ;;  %v286_v13 = vsel %vm284_vm0, 0.0, %v275_v10 }
  0x92   : > { %v2596_v14 = vsel %vm289_vm1, %v288_v12, 0.0  ;;  %v2598_v15 = vpack.c.bf16 %v288_v12, %v287_v6  ;;  %v2601_v16 = vsel %vm289_vm1, %v286_v13, 0.0  ;;  %v2118_v17 = vpack.c.bf16 %v286_v13, %v285_v7 }
  0x93   : > { %v2287_v18 = vpack.i.bf16 %v2596_v14, %v2588_v8  ;;  %v2282_v19 = vpack.i.bf16 %v2601_v16, %v2591_v11 }
  0x95   : > { %2288 = vrot.lane.b32.xlu1 %v2287_v18, %s2481_s15  ;;  %2283 = vrot.lane.b32.xlu0 %v2282_v19, %s2481_s15  ;;  %s2484_s15 = smov 2  }
  0x99   : > { %2298 = vrot.lane.b32.xlu1 %v2287_v18, %s2482_s16  ;;  %2293 = vrot.lane.b32.xlu0 %v2282_v19, %s2482_s16  ;;  %s2485_s16 = smov 126  }
  0x9d   : > { %368 = vperm.xlu1 %2303, %v338_v21   ;;  %363 = vperm.xlu0 %2302, %v337_v22  }
  0xa1   : > { %373 = vperm.xlu1 %2303, %v339_v24   ;;  %378 = vperm.xlu0 %2302, %v340_v25  }
  0xa5   : > { %343 = vperm.xlu1 %2303, %v333_v26   ;;  %348 = vperm.xlu0 %2302, %v334_v27  }
  0xa9   : > { %353 = vperm.xlu1 %2303, %v335_v28   ;;  %358 = vperm.xlu0 %2302, %v336_v29  }
  0xad   : > { %561 = vperm.xlu1 %2303, %v551_v30   ;;  %566 = vperm.xlu0 %2302, %v552_v31  }
  0xb1   : > { %571 = vperm.xlu1 %2303, %v553_v32   ;;  %576 = vperm.xlu0 %2302, %v554_v33  }
  0xb5   : > { %300 = vrot.lane.b32.xlu1 %v1710_v58, %s2480_s14 }
 0x107   : > { %v2289_v34 = vpop.permute.xlu1 %2288  ;;  %v2284_v35 = vpop.permute.xlu0 %2283 }
 0x108   : > { %v2291_v36 = vunpack.i.h.bf16 %v2289_v34  ;;  %v2290_v37 = vunpack.i.l.bf16 %v2289_v34  ;;  %v2286_v38 = vunpack.i.h.bf16 %v2284_v35  ;;  %v2285_v39 = vunpack.i.l.bf16 %v2284_v35 }
 0x10a   : > { %v2110_v40 = vpack.c.bf16 %v2286_v38, %v2285_v39  ;;  %v2114_v41 = vpack.c.bf16 %v2291_v36, %v2290_v37 }
 0x10b   : > { %v2294_v42 = vpop.permute.xlu0 %2293  ;;  %v2299_v45 = vpop.permute.xlu1 %2298 }
 0x10c   : > { %2111 = vmatprep.subr.bf16.mxu0 %v2110_v40  ;;  %v2296_v43 = vunpack.i.h.bf16 %v2294_v42  ;;  %v2295_v44 = vunpack.i.l.bf16 %v2294_v42  ;;  %v2301_v46 = vunpack.i.h.bf16 %v2299_v45  ;;  %v2300_v47 = vunpack.i.l.bf16 %v2299_v45 }
 0x10d   : > { %2113 = vmatpush3.bf16.msra.mxu0 %v2110_v40 }
 0x10e   : > { %2115 = vmatprep.subr.bf16.mxu0 %v2114_v41  ;;  %v2130_v48 = vpack.c.bf16 %v2296_v43, %v2295_v44  ;;  %v2134_v49 = vpack.c.bf16 %v2301_v46, %v2300_v47 }
 0x111   : > { %2117 = vmatpush3.bf16.msra.mxu0 %v2114_v41 }
 0x112   : > { %2120 = vmatprep.subr.msk.bf16.mxu0 %vm2119_vm3, %v2118_v17 }
 0x115   : > { %2123 = vmatpush3.bf16.msk.msra.mxu0 %vm2119_vm3, %v2118_v17 }
 0x116   : > { %2126 = vmatprep.subr.msk.bf16.mxu0 %vm2119_vm3, %v2598_v15 }
 0x119   : > { %2129 = vmatpush3.bf16.msk.msra.mxu0 %vm2119_vm3, %v2598_v15 }
 0x11a   : > { %2131 = vmatprep.subr.bf16.mxu0 %v2130_v48 }
 0x11c   : > { %v364_v62 = vpop.permute.xlu0 %363  ;;  %v369_v0 = vpop.permute.xlu1 %368 }
 0x11d   : > { %2133 = vmatpush3.bf16.msra.mxu0 %v2130_v48 }
 0x11e   : > { %2135 = vmatprep.subr.bf16.mxu0 %v2134_v49 }
 0x120   : > { %v379_v5 = vpop.permute.xlu0 %378  ;;  %v374_v7 = vpop.permute.xlu1 %373 }
 0x121   : > { %2137 = vmatpush3.bf16.msra.mxu0 %v2134_v49  ;;  %v544_v49 = vld [vmem:[%s3050_s4 + $0x8] sm:$0xff] }
 0x124   : > { %1967 = vmatmul.mubr.msk.f32.vlgmr.msra.gmra.mrb[0].mxu0 %vm381_vm2, %v326_v50  ;;  %v349_v19 = vpop.permute.xlu0 %348  ;;  %v344_v20 = vpop.permute.xlu1 %343  ;;  %v545_v50 = vld [vmem:[%s3050_s4 + $0x10] sm:$0xff] }
 0x125   : > { %1969 = vmatprep.mubr.msk.f32.mxu0 %vm381_vm2, %v327_v51  ;;  %v546_v51 = vld [vmem:[%s3050_s4 + $0x18] sm:$0xff] }
 0x128   : > { %1970 = vmatmul.mubr.msk.f32.gmra.mrb[2].mxu0 %vm381_vm2, %v328_v52  ;;  %v359_v24 = vpop.permute.xlu0 %358  ;;  %v354_v26 = vpop.permute.xlu1 %353 }
 0x129   : > { %1972 = vmatprep.mubr.msk.f32.mxu0 %vm381_vm2, %v329_v53 }
 0x12c   : > { %1973 = vmatmul.mubr.msk.f32.gmra.mrb[4].mxu0 %vm381_vm2, %v330_v54  ;;  %v562_v52 = vpop.permute.xlu1 %561  ;;  %v305_v54 = vlaneseq }
 0x12d   : > { %1975 = vmatprep.mubr.msk.f32.mxu0 %vm381_vm2, %v331_v55 }
 0x130   : > { %1976 = vmatmul.mubr.msk.f32.gmra.mrb[6].mxu0 %vm381_vm2, %v332_v56  ;;  %v572_v53 = vpop.permute.xlu1 %571  ;;  %v306_v56 = vshrl.u32 %v305_v54, 7  ;;  %v1738_v54 = vld [vmem:[%s3048_s2 + $0x58] sm:$0xff] }
 0x132   : > { %v307_v58 = vsub.s32 0, %v306_v56  ;;  %v1740_v56 = vld [vmem:[%s3048_s2 + $0x68] sm:$0xff] }
 0x134   : > { %v301_v55 = vpop.permute.xlu1 %300 }
 0x135   : > { %v303_v57 = vsel %vm284_vm0, 0.0, %v301_v55  ;;  %v1739_v55 = vld [vmem:[%s3048_s2 + $0x60] sm:$0xff] }
 0x1f7   : > { %v1968_v59 = vpop.f32.mrb[0].mxu0 }
 0x1f8   : > { %v472_v60 = vpop.f32.mrb[1].mxu0  ;;  %v478_v21 = vadd.f32 %v1968_v59, %v349_v19  ;;  %v567_v59 = vpop.permute.xlu0 %566  ;;  %v548_v19 = vld [vmem:[%s3050_s4 + $0x28] sm:$0xff] }
 0x1f9   : > { %v473_v22 = vadd.f32 %v472_v60, %v344_v20  ;;  %v304_v60 = vsel %vm289_vm1, %v303_v57, 0.0  ;;  %v1748_v20 = vld [vmem:[%s3049_s3 + $0x68] sm:$0xff]  ;;  %v1741_v57 = vld [vmem:[%s3048_s2 + $0x70] sm:$0xff] }
 0x1fb   : > { %v1971_v61 = vpop.f32.mrb[2].mxu0 }
 0x1fc   : > { %v482_v63 = vpop.f32.mrb[3].mxu0  ;;  %v488_v27 = vadd.f32 %v1971_v61, %v359_v24  ;;  %v1735_v24 = vld [vmem:[%s3048_s2 + $0x40] sm:$0xff] }
 0x1fd   : > { %v483_v29 = vadd.f32 %v482_v63, %v354_v26  ;;  %v1743_v26 = vld [vmem:[%s3049_s3 + $0x40] sm:$0xff] }
 0x1ff   : > { %v1974_v1 = vpop.f32.mrb[4].mxu0 }
 0x200   : > { %v498_v2 = vadd.f32 %v1974_v1, %v369_v0  ;;  %v492_v3 = vpop.f32.mrb[5].mxu0 }
 0x201   : > { %v493_v4 = vadd.f32 %v492_v3, %v364_v62  ;;  %v2702_v62 = vrot.slane %v304_v60, %v307_v58  ;;  %v577_v3 = vpop.permute.xlu0 %576  ;;  %v1742_v58 = vld [vmem:[%s3048_s2 + $0x78] sm:$0xff] }
 0x202   : > { %v1724_v6 = vmul.f32 -1.442695, %v498_v2 }
 0x203   : > { %v1723_v9 = vmul.f32 -1.442695, %v493_v4  ;;  %v1977_v10 = vpop.f32.mrb[6].mxu0 }
 0x204   : > { %2344 = vpow2.f32 %v1724_v6  ;;  %v508_v12 = vadd.f32 %v1977_v10, %v379_v5  ;;  %v502_v13 = vpop.f32.mrb[7].mxu0 }
 0x205   : > { %2346 = vpow2.f32 %v1723_v9  ;;  %v503_v15 = vadd.f32 %v502_v13, %v374_v7 }
 0x206   : > { %v1726_v17 = vmul.f32 -1.442695, %v508_v12 }
 0x207   : > { %v1725_v18 = vmul.f32 -1.442695, %v503_v15 }
 0x208   : > { %2348 = vpow2.f32 %v1726_v17 }
 0x209   : > { %2350 = vpow2.f32 %v1725_v18 }
 0x20a   : > { %2352 = vtanh.f32 %v478_v21  ;;  %v1749_v21 = vld [vmem:[%s3049_s3 + $0x70] sm:$0xff] }
 0x20b   : > { %2354 = vtanh.f32 %v473_v22  ;;  %v549_v22 = vld [vmem:[%s3050_s4 + $0x30] sm:$0xff] }
 0x20e   : > { %v2345_v23 = vpop.eup %2344 }
 0x20f   : > { %v2347_v25 = vpop.eup %2346  ;;  %v528_v28 = vadd.f32 1.0, %v2345_v23  ;;  %v550_v23 = vld [vmem:[%s3050_s4 + $0x38] sm:$0xff] }
 0x210   : > { %v527_v30 = vadd.f32 1.0, %v2347_v25  ;;  %v1750_v25 = vld [vmem:[%s3049_s3 + $0x78] sm:$0xff] }
 0x211   : > { %2356 = vrcp.f32 %v528_v28  ;;  %v1745_v28 = vld [vmem:[%s3049_s3 + $0x50] sm:$0xff] }
 0x212   : > { %v2349_v31 = vpop.eup %2348  ;;  %2358 = vrcp.f32 %v527_v30  ;;  %v1771_v30 = vld [vmem:[%s3051_s5 + $0x40] sm:$0xff] }
 0x213   : > { %v2351_v32 = vpop.eup %2350  ;;  %2360 = vtanh.f32 %v488_v27  ;;  %v530_v33 = vadd.f32 1.0, %v2349_v31  ;;  %v1744_v27 = vld [vmem:[%s3049_s3 + $0x48] sm:$0xff] }
 0x214   : > { %2362 = vtanh.f32 %v483_v29  ;;  %v529_v34 = vadd.f32 1.0, %v2351_v32  ;;  %v2353_v35 = vpop.eup %2352  ;;  %v1746_v29 = vld [vmem:[%s3049_s3 + $0x58] sm:$0xff]  ;;  %v1772_v31 = vld [vmem:[%s3051_s5 + $0x48] sm:$0xff]  ;;  %v1773_v32 = vld [vmem:[%s3051_s5 + $0x50] sm:$0xff] }
 0x215   : > { %2364 = vrcp.f32 %v530_v33  ;;  %v2355_v36 = vpop.eup %2354  ;;  %v1774_v33 = vld [vmem:[%s3051_s5 + $0x58] sm:$0xff] }
 0x216   : > { %2366 = vrcp.f32 %v529_v34 }
 0x21b   : > { %v2357_v37 = vpop.eup %2356 }
 0x21c   : > { %v2359_v38 = vpop.eup %2358  ;;  %v540_v39 = vmul.f32 %v2357_v37, %v2353_v35 }
 0x21d   : > { %v2361_v40 = vpop.eup %2360  ;;  %v539_v41 = vmul.f32 %v2359_v38, %v2355_v36 }
 0x21e   : > { %v2363_v42 = vpop.eup %2362 }
 0x21f   : > { %v2365_v43 = vpop.eup %2364  ;;  %v2138_v44 = vpack.c.bf16 %v540_v39, %v539_v41 }
 0x220   : > { %v2367_v45 = vpop.eup %2366  ;;  %v542_v46 = vmul.f32 %v2365_v43, %v2361_v40 }
 0x221   : > { %2139 = vmatprep.subr.bf16.mxu1 %v2138_v44  ;;  %v541_v47 = vmul.f32 %v2367_v45, %v2363_v42 }
 0x222   : > { %2141 = vmatpush3.bf16.msra.mxu1 %v2138_v44 }
 0x223   : > { %v2142_v48 = vpack.c.bf16 %v542_v46, %v541_v47 }
 0x225   : > { %2143 = vmatprep.subr.bf16.mxu1 %v2142_v48 }
 0x226   : > { %2145 = vmatpush3.bf16.msra.mxu1 %v2142_v48 }
 0x229   : > { %1987 = vmatmul.mubr.msk.f32.vlgmr.msra.gmra.mrb[0].mxu1 %vm599_vm4, %v544_v49 }
 0x22a   : > { %1989 = vmatprep.mubr.msk.f32.mxu1 %vm599_vm4, %v545_v50 }
 0x22d   : > { %1990 = vmatmul.mubr.msk.f32.gmra.mrb[2].mxu1 %vm599_vm4, %v546_v51 }
 0x2fc   : > { %v1988_v61 = vpop.f32.mrb[0].mxu1 }
 0x2fd   : > { %v696_v63 = vadd.f32 %v1988_v61, %v567_v59  ;;  %v690_v0 = vpop.f32.mrb[1].mxu1  ;;  %v1763_v59 = vld [vmem:[%s3050_s4 + $0x40] sm:$0xff] }
 0x2fe   : > { %v691_v1 = vadd.f32 %v690_v0, %v562_v52  ;;  %v1736_v52 = vld [vmem:[%s3048_s2 + $0x48] sm:$0xff] }
 0x2ff   : > { %v730_v2 = vadd.f32 %v696_v63, %v2601_v16 }
 0x300   : > { %v729_v4 = vadd.f32 %v691_v1, %v2591_v11  ;;  %v1991_v5 = vpop.f32.mrb[2].mxu1 }
 0x301   : > { %v2707_v6 = vmul.f32 %v730_v2, %v2702_v62  ;;  %v706_v7 = vadd.f32 %v1991_v5, %v577_v3  ;;  %v700_v9 = vpop.f32.mrb[3].mxu1 }
 0x302   : > { %v2710_v10 = vmul.f32 %v729_v4, %v2702_v62  ;;  %v701_v12 = vadd.f32 %v700_v9, %v572_v53  ;;  %v1737_v53 = vld [vmem:[%s3048_s2 + $0x50] sm:$0xff] }
 0x303   : > { %v732_v13 = vadd.f32 %v706_v7, %v2596_v14  ;;  %v547_v14 = vld [vmem:[%s3050_s4 + $0x20] sm:$0xff] }
 0x304   : > { %v731_v15 = vadd.f32 %v701_v12, %v2588_v8  ;;  %v2304_v16 = vpack.i.bf16 %v2707_v6, %v2710_v10  ;;  %v1747_v8 = vld [vmem:[%s3049_s3 + $0x60] sm:$0xff]  ;;  %1992 = vmatprep.mubr.msk.f32.mxu1 %vm599_vm4, %v547_v14  ;;  %v2154_v42 = vpack.c.bf16 %v2707_v6, %v2710_v10 }
 0x305   : > { %v2717_v17 = vmul.f32 %v732_v13, %v2702_v62  ;;  %1993 = vmatmul.mubr.msk.f32.gmra.mrb[4].mxu1 %vm599_vm4, %v548_v19 }
 0x306   : > { %v2720_v11 = vmul.f32 %v731_v15, %v2702_v62  ;;  %2305 = vrot.lane.b32.xlu0 %v2304_v16, %s2484_s15  ;;  %1995 = vmatprep.mubr.msk.f32.mxu1 %vm599_vm4, %v549_v22 }
 0x308   : > { %v2309_v18 = vpack.i.bf16 %v2717_v17, %v2720_v11  ;;  %v2158_v46 = vpack.c.bf16 %v2717_v17, %v2720_v11 }
 0x309   : > { %1996 = vmatmul.mubr.msk.f32.gmra.mrb[6].mxu1 %vm599_vm4, %v550_v23 }
 0x30a   : > { %2310 = vrot.lane.b32.xlu1 %v2309_v18, %s2484_s15  ;;  %2315 = vrot.lane.b32.xlu0 %v2304_v16, %s2485_s16  ;;  %s255_s15 = scalar_lea.vmem [#allocation2], %s1707_s13 }
 0x30b   : > { %2022 = vmatprep.mubr.msk.f32.mxu1 %vm381_vm2, %v1735_v24  ;;  %s1632_s17 = sshll.u32 %s255_s15, 4  ;;  %s2998_s17 = int_to_ptr.vmem [resolvable:$true] %s1632_s17 }
 0x30c   : > { %s2416_s25 = scalar_lea.vmem %s2998_s17, 512  ;;  %p2423_p0 = scmp.lt.s32.totalorder %s2998_s17, %s2421_s9 }
 0x30d   : > { %p2417_p11 = scmp.ne.s32.totalorder %s2998_s17, %s2416_s25 }
 0x30e   : > { %2320 = vrot.lane.b32.xlu1 %v2309_v18, %s2485_s16  ;;  %797 = vperm.xlu0 %2302, %v1747_v8   ;;  %s2486_s16 = smov 124  }
 0x30f   : > { %p2418_p12 = pnand %p2417_p11, %p2563_p5 }
 0x311   : > { %p2419_p13 = pneg %p2418_p12 }
 0x312   : > { %802 = vperm.xlu1 %2303, %v1748_v20   ;;  %807 = vperm.xlu0 %2302, %v1749_v21  }
 0x316   : > { %812 = vperm.xlu1 %2303, %v1750_v25   ;;  %777 = vperm.xlu0 %2302, %v1743_v26  }
 0x31a   : > { %782 = vperm.xlu1 %2303, %v1744_v27   ;;  %787 = vperm.xlu0 %2302, %v1745_v28  }
 0x31e   : > { %792 = vperm.xlu1 %2303, %v1746_v29   ;;  %996 = vperm.xlu0 %2302, %v1771_v30  }
 0x322   : > { %1001 = vperm.xlu1 %2303, %v1772_v31   ;;  %1006 = vperm.xlu0 %2302, %v1773_v32  }
 0x326   : > { %1011 = vperm.xlu1 %2303, %v1774_v33  }
 0x378   : > { %v2306_v34 = vpop.permute.xlu0 %2305 }
 0x379   : > { %v2308_v35 = vunpack.i.h.bf16 %v2306_v34  ;;  %v2307_v36 = vunpack.i.l.bf16 %v2306_v34 }
 0x37b   : > { %v2146_v37 = vpack.c.bf16 %v2308_v35, %v2307_v36 }
 0x37c   : > { %v2311_v38 = vpop.permute.xlu1 %2310  ;;  %v2316_v43 = vpop.permute.xlu0 %2315 }
 0x37d   : > { %v2313_v39 = vunpack.i.h.bf16 %v2311_v38  ;;  %v2312_v40 = vunpack.i.l.bf16 %v2311_v38  ;;  %2147 = vmatprep.subr.bf16.mxu1 %v2146_v37  ;;  %v2318_v44 = vunpack.i.h.bf16 %v2316_v43  ;;  %v2317_v45 = vunpack.i.l.bf16 %v2316_v43 }
 0x37e   : > { %2149 = vmatpush3.bf16.msra.mxu1 %v2146_v37 }
 0x37f   : > { %v2150_v41 = vpack.c.bf16 %v2313_v39, %v2312_v40  ;;  %v2162_v48 = vpack.c.bf16 %v2318_v44, %v2317_v45 }
 0x380   : > { %v2321_v47 = vpop.permute.xlu1 %2320 }
 0x381   : > { %2151 = vmatprep.subr.bf16.mxu1 %v2150_v41  ;;  %v2323_v49 = vunpack.i.h.bf16 %v2321_v47  ;;  %v2322_v50 = vunpack.i.l.bf16 %v2321_v47 }
 0x382   : > { %2153 = vmatpush3.bf16.msra.mxu1 %v2150_v41 }
 0x383   : > { %2155 = vmatprep.subr.bf16.mxu1 %v2154_v42  ;;  %v2166_v51 = vpack.c.bf16 %v2323_v49, %v2322_v50 }
 0x386   : > { %2157 = vmatpush3.bf16.msra.mxu1 %v2154_v42 }
 0x387   : > { %2159 = vmatprep.subr.bf16.mxu1 %v2158_v46 }
 0x38a   : > { %2161 = vmatpush3.bf16.msra.mxu1 %v2158_v46 }
 0x38b   : > { %2163 = vmatprep.subr.bf16.mxu1 %v2162_v48 }
 0x38d   : > { %v798_v2 = vpop.permute.xlu0 %797 }
 0x38e   : > { %2165 = vmatpush3.bf16.msra.mxu1 %v2162_v48 }
 0x38f   : > { %2167 = vmatprep.subr.bf16.mxu1 %v2166_v51 }
 0x391   : > { %v803_v0 = vpop.permute.xlu1 %802  ;;  %v808_v13 = vpop.permute.xlu0 %807 }
 0x392   : > { %2169 = vmatpush3.bf16.msra.mxu1 %v2166_v51  ;;  %v1764_v51 = vld [vmem:[%s3050_s4 + $0x48] sm:$0xff] }
 0x395   : > { %2023 = vmatmul.mubr.msk.f32.vlgmr.msra.gmra.mrb[8].mxu1 %vm381_vm2, %v1736_v52  ;;  %v813_v9 = vpop.permute.xlu1 %812  ;;  %v778_v22 = vpop.permute.xlu0 %777  ;;  %v1765_v52 = vld [vmem:[%s3050_s4 + $0x50] sm:$0xff] }
 0x396   : > { %2025 = vmatprep.mubr.msk.f32.mxu1 %vm381_vm2, %v1737_v53  ;;  %v1766_v53 = vld [vmem:[%s3050_s4 + $0x58] sm:$0xff] }
 0x399   : > { %2026 = vmatmul.mubr.msk.f32.gmra.mrb[10].mxu1 %vm381_vm2, %v1738_v54  ;;  %v783_v21 = vpop.permute.xlu1 %782  ;;  %v788_v28 = vpop.permute.xlu0 %787 }
 0x39a   : > { %2028 = vmatprep.mubr.msk.f32.mxu1 %vm381_vm2, %v1739_v55 }
 0x39d   : > { %2029 = vmatmul.mubr.msk.f32.gmra.mrb[12].mxu1 %vm381_vm2, %v1740_v56  ;;  %v793_v26 = vpop.permute.xlu1 %792  ;;  %v997_v55 = vpop.permute.xlu0 %996 }
 0x39e   : > { %2031 = vmatprep.mubr.msk.f32.mxu1 %vm381_vm2, %v1741_v57 }
 0x3a1   : > { %2032 = vmatmul.mubr.msk.f32.gmra.mrb[14].mxu1 %vm381_vm2, %v1742_v58  ;;  %v1002_v54 = vpop.permute.xlu1 %1001 }
 0x3a2   : > { %2042 = vmatprep.mubr.msk.f32.mxu1 %vm599_vm4, %v1763_v59 }
 0x468   : > { %v2024_v60 = vpop.f32.mrb[8].mxu1 }
 0x469   : > { %v905_v61 = vpop.f32.mrb[9].mxu1  ;;  %v911_v23 = vadd.f32 %v2024_v60, %v783_v21  ;;  %v1796_v21 = vld [vmem:[%s3049_s3 + $0x88] sm:$0xff] }
 0x46a   : > { %v906_v24 = vadd.f32 %v905_v61, %v778_v22  ;;  %v1012_v61 = vpop.permute.xlu1 %1011  ;;  %v1797_v22 = vld [vmem:[%s3049_s3 + $0x90] sm:$0xff] }
 0x46c   : > { %v2027_v63 = vpop.f32.mrb[10].mxu1 }
 0x46d   : > { %v915_v1 = vpop.f32.mrb[11].mxu1  ;;  %v921_v29 = vadd.f32 %v2027_v63, %v793_v26  ;;  %v557_v26 = vld [vmem:[%s3051_s5 + $0x30] sm:$0xff] }
 0x46e   : > { %v916_v31 = vadd.f32 %v915_v1, %v788_v28  ;;  %v1007_v1 = vpop.permute.xlu0 %1006  ;;  %v1775_v28 = vld [vmem:[%s3051_s5 + $0x60] sm:$0xff] }
 0x470   : > { %v2030_v3 = vpop.f32.mrb[12].mxu1 }
 0x471   : > { %v931_v4 = vadd.f32 %v2030_v3, %v803_v0  ;;  %v925_v5 = vpop.f32.mrb[13].mxu1 }
 0x472   : > { %v926_v7 = vadd.f32 %v925_v5, %v798_v2 }
 0x473   : > { %v1760_v12 = vmul.f32 -1.442695, %v931_v4 }
 0x474   : > { %v1759_v15 = vmul.f32 -1.442695, %v926_v7  ;;  %v2033_v16 = vpop.f32.mrb[14].mxu1 }
 0x475   : > { %2368 = vpow2.f32 %v1760_v12  ;;  %v941_v18 = vadd.f32 %v2033_v16, %v813_v9  ;;  %v935_v8 = vpop.f32.mrb[15].mxu1 }
 0x476   : > { %2370 = vpow2.f32 %v1759_v15  ;;  %v936_v14 = vadd.f32 %v935_v8, %v808_v13  ;;  %v1801_v8 = vld [vmem:[%s3049_s3 + $0xb0] sm:$0xff] }
 0x477   : > { %v1762_v19 = vmul.f32 -1.442695, %v941_v18 }
 0x478   : > { %v1761_v20 = vmul.f32 -1.442695, %v936_v14  ;;  %v1787_v14 = vld [vmem:[%s3048_s2 + $0x80] sm:$0xff] }
 0x479   : > { %2372 = vpow2.f32 %v1762_v19  ;;  %v1802_v19 = vld [vmem:[%s3049_s3 + $0xb8] sm:$0xff]  ;;  %2078 = vmatprep.mubr.msk.f32.mxu0 %vm381_vm2, %v1787_v14 }
 0x47a   : > { %2374 = vpow2.f32 %v1761_v20  ;;  %v1795_v20 = vld [vmem:[%s3049_s3 + $0x80] sm:$0xff] }
 0x47b   : > { %2376 = vtanh.f32 %v911_v23  ;;  %v1798_v23 = vld [vmem:[%s3049_s3 + $0x98] sm:$0xff] }
 0x47c   : > { %2378 = vtanh.f32 %v906_v24  ;;  %v555_v24 = vld [vmem:[%s3051_s5 + $0x20] sm:$0xff] }
 0x47f   : > { %v2369_v25 = vpop.eup %2368 }
 0x480   : > { %v2371_v27 = vpop.eup %2370  ;;  %v961_v30 = vadd.f32 1.0, %v2369_v25  ;;  %v556_v25 = vld [vmem:[%s3051_s5 + $0x28] sm:$0xff] }
 0x481   : > { %v960_v32 = vadd.f32 1.0, %v2371_v27  ;;  %v558_v27 = vld [vmem:[%s3051_s5 + $0x38] sm:$0xff] }
 0x482   : > { %2380 = vrcp.f32 %v961_v30  ;;  %v1777_v30 = vld [vmem:[%s3051_s5 + $0x70] sm:$0xff] }
 0x483   : > { %v2373_v33 = vpop.eup %2372  ;;  %2382 = vrcp.f32 %v960_v32  ;;  %v1827_v32 = vld [vmem:[%s3051_s5 + $0xa0] sm:$0xff] }
 0x484   : > { %v2375_v34 = vpop.eup %2374  ;;  %2384 = vtanh.f32 %v921_v29  ;;  %v963_v35 = vadd.f32 1.0, %v2373_v33  ;;  %v1776_v29 = vld [vmem:[%s3051_s5 + $0x68] sm:$0xff] }
 0x485   : > { %2386 = vtanh.f32 %v916_v31  ;;  %v962_v36 = vadd.f32 1.0, %v2375_v34  ;;  %v2377_v37 = vpop.eup %2376  ;;  %v1778_v31 = vld [vmem:[%s3051_s5 + $0x78] sm:$0xff]  ;;  %v1828_v33 = vld [vmem:[%s3051_s5 + $0xa8] sm:$0xff]  ;;  %v1829_v34 = vld [vmem:[%s3051_s5 + $0xb0] sm:$0xff] }
 0x486   : > { %2388 = vrcp.f32 %v963_v35  ;;  %v2379_v38 = vpop.eup %2378  ;;  %v1830_v35 = vld [vmem:[%s3051_s5 + $0xb8] sm:$0xff] }
 0x487   : > { %2390 = vrcp.f32 %v962_v36 }
 0x48c   : > { %v2381_v39 = vpop.eup %2380 }
 0x48d   : > { %v2383_v40 = vpop.eup %2382  ;;  %v973_v41 = vmul.f32 %v2381_v39, %v2377_v37 }
 0x48e   : > { %v2385_v42 = vpop.eup %2384  ;;  %v972_v43 = vmul.f32 %v2383_v40, %v2379_v38 }
 0x48f   : > { %v2387_v44 = vpop.eup %2386 }
 0x490   : > { %v2389_v45 = vpop.eup %2388  ;;  %v2170_v46 = vpack.c.bf16 %v973_v41, %v972_v43 }
 0x491   : > { %v2391_v47 = vpop.eup %2390  ;;  %v975_v48 = vmul.f32 %v2389_v45, %v2385_v42 }
 0x492   : > { %2171 = vmatprep.subr.bf16.mxu1 %v2170_v46  ;;  %v974_v49 = vmul.f32 %v2391_v47, %v2387_v44 }
 0x493   : > { %2173 = vmatpush3.bf16.msra.mxu1 %v2170_v46 }
 0x494   : > { %v2174_v50 = vpack.c.bf16 %v975_v48, %v974_v49 }
 0x496   : > { %2175 = vmatprep.subr.bf16.mxu1 %v2174_v50 }
 0x497   : > { %2177 = vmatpush3.bf16.msra.mxu1 %v2174_v50 }
 0x49a   : > { %2043 = vmatmul.mubr.msk.f32.vlgmr.msra.gmra.mrb[16].mxu1 %vm599_vm4, %v1764_v51 }
 0x49b   : > { %2045 = vmatprep.mubr.msk.f32.mxu1 %vm599_vm4, %v1765_v52  ;;  %v1788_v52 = vld [vmem:[%s3048_s2 + $0x88] sm:$0xff] }
 0x49e   : > { %2046 = vmatmul.mubr.msk.f32.gmra.mrb[18].mxu1 %vm599_vm4, %v1766_v53  ;;  %v1789_v53 = vld [vmem:[%s3048_s2 + $0x90] sm:$0xff] }
 0x56d   : > { %v2044_v56 = vpop.f32.mrb[16].mxu1 }
 0x56e   : > { %v1130_v57 = vadd.f32 %v2044_v56, %v1002_v54  ;;  %v1124_v58 = vpop.f32.mrb[17].mxu1  ;;  %v1790_v54 = vld [vmem:[%s3048_s2 + $0x98] sm:$0xff]  ;;  %v1792_v56 = vld [vmem:[%s3048_s2 + $0xa8] sm:$0xff] }
 0x56f   : > { %v1125_v59 = vadd.f32 %v1124_v58, %v997_v55  ;;  %v1791_v55 = vld [vmem:[%s3048_s2 + $0xa0] sm:$0xff]  ;;  %v1794_v58 = vld [vmem:[%s3048_s2 + $0xb8] sm:$0xff] }
 0x570   : > { %v1164_v60 = vadd.f32 %v1130_v57, %v2707_v6  ;;  %v1793_v57 = vld [vmem:[%s3048_s2 + $0xb0] sm:$0xff] }
 0x571   : > { %v1163_v63 = vadd.f32 %v1125_v59, %v2710_v10  ;;  %v2047_v0 = vpop.f32.mrb[18].mxu1  ;;  %v1767_v59 = vld [vmem:[%s3050_s4 + $0x60] sm:$0xff] }
 0x572   : > { %v1168_v2 = vmul.f32 %v1164_v60, %v2702_v62  ;;  %v1140_v3 = vadd.f32 %v2047_v0, %v1012_v61  ;;  %v1134_v4 = vpop.f32.mrb[19].mxu1  ;;  %v1768_v60 = vld [vmem:[%s3050_s4 + $0x68] sm:$0xff]  ;;  %2048 = vmatprep.mubr.msk.f32.mxu1 %vm599_vm4, %v1767_v59  ;;  %v1769_v61 = vld [vmem:[%s3050_s4 + $0x70] sm:$0xff]  ;;  %v1819_v0 = vld [vmem:[%s3050_s4 + $0xa0] sm:$0xff] }
 0x573   : > { %v1167_v5 = vmul.f32 %v1163_v63, %v2702_v62  ;;  %v1135_v7 = vadd.f32 %v1134_v4, %v1007_v1  ;;  %2049 = vmatmul.mubr.msk.f32.gmra.mrb[4].mxu1 %vm599_vm4, %v1768_v60  ;;  %v1770_v63 = vld [vmem:[%s3050_s4 + $0x78] sm:$0xff]  ;;  %v1815_v1 = vld [vmem:[%s3050_s4 + $0x80] sm:$0xff] }
 0x574   : > { %v1166_v9 = vadd.f32 %v1140_v3, %v2717_v17  ;;  %v1799_v17 = vld [vmem:[%s3049_s3 + $0xa0] sm:$0xff]  ;;  %2051 = vmatprep.mubr.msk.f32.mxu1 %vm599_vm4, %v1769_v61 }
 0x575   : > { %v1165_v12 = vadd.f32 %v1135_v7, %v2720_v11  ;;  %v2324_v13 = vpack.i.bf16 %v1168_v2, %v1167_v5  ;;  %v2834_v15 = vpack.c.bf16 %v1168_v2, %v1167_v5  ;;  %v1800_v11 = vld [vmem:[%s3049_s3 + $0xa8] sm:$0xff] }
 0x576   : > { %v1170_v6 = vmul.f32 %v1166_v9, %v2702_v62 }
 0x577   : > { %v1169_v10 = vmul.f32 %v1165_v12, %v2702_v62  ;;  %2325 = vrot.lane.b32.xlu0 %v2324_v13, %s2480_s14  ;;  %2052 = vmatmul.mubr.msk.f32.gmra.mrb[6].mxu1 %vm599_vm4, %v1770_v63 }
 0x578   : > { %2104 = vmatprep.mubr.msk.f32.mxu1 %vm599_vm4, %v1819_v0 }
 0x579   : > { %v2329_v16 = vpack.i.bf16 %v1170_v6, %v1169_v10  ;;  %v2839_v18 = vpack.c.bf16 %v1170_v6, %v1169_v10 }
 0x57b   : > { %2330 = vrot.lane.b32.xlu1 %v2329_v16, %s2480_s14  ;;  %2335 = vrot.lane.b32.xlu0 %v2324_v13, %s2486_s16  ;;  %s2422_s14 = scalar_lea.vmem %s2421_s9, 1024 }
 0x57c   : > { %p2424_p1 = scmp.lt.s32.totalorder %s2422_s14, %s2416_s25 }
 0x57e   : > { %p2425_p2 = por %p2424_p1, %p2423_p0 }
 0x57f   : > { %2340 = vrot.lane.b32.xlu1 %v2329_v16, %s2486_s16  ;;  %1231 = vperm.xlu0 %2302, %v1799_v17  }
 0x580   : > { %p2426_p3 = pnand %p2425_p2, %p2419_p13 }
 0x583   : > { %1236 = vperm.xlu1 %2303, %v1800_v11   ;;  %1241 = vperm.xlu0 %2302, %v1801_v8  }
 0x587   : > { %1246 = vperm.xlu1 %2303, %v1802_v19   ;;  %1211 = vperm.xlu0 %2302, %v1795_v20  }
 0x58b   : > { %1216 = vperm.xlu1 %2303, %v1796_v21   ;;  %1221 = vperm.xlu0 %2302, %v1797_v22  }
 0x58f   : > { %1226 = vperm.xlu1 %2303, %v1798_v23   ;;  %581 = vperm.xlu0 %2302, %v555_v24  }
 0x593   : > { %586 = vperm.xlu1 %2303, %v556_v25   ;;  %591 = vperm.xlu0 %2302, %v557_v26  }
 0x597   : > { %596 = vperm.xlu1 %2303, %v558_v27   ;;  %1016 = vperm.xlu0 %2302, %v1775_v28  }
 0x59b   : > { %1021 = vperm.xlu1 %2303, %v1776_v29   ;;  %1026 = vperm.xlu0 %2302, %v1777_v30  }
 0x59f   : > { %1031 = vperm.xlu1 %2303, %v1778_v31   ;;  %1446 = vperm.xlu0 %2302, %v1827_v32  }
 0x5a3   : > { %1451 = vperm.xlu1 %2303, %v1828_v33   ;;  %1456 = vperm.xlu0 %2302, %v1829_v34  }
 0x5a7   : > { %1461 = vperm.xlu1 %2303, %v1830_v35  }
 0x5e9   : > { %v2326_v36 = vpop.permute.xlu0 %2325 }
 0x5ea   : > { %v2328_v37 = vunpack.i.h.bf16 %v2326_v36  ;;  %v2327_v38 = vunpack.i.l.bf16 %v2326_v36 }
 0x5ec   : > { %v2178_v39 = vpack.c.bf16 %v2328_v37, %v2327_v38 }
 0x5ed   : > { %v2331_v40 = vpop.permute.xlu1 %2330  ;;  %v2336_v44 = vpop.permute.xlu0 %2335 }
 0x5ee   : > { %v2333_v41 = vunpack.i.h.bf16 %v2331_v40  ;;  %v2332_v42 = vunpack.i.l.bf16 %v2331_v40  ;;  %2179 = vmatprep.subr.bf16.mxu0 %v2178_v39  ;;  %v2338_v45 = vunpack.i.h.bf16 %v2336_v44  ;;  %v2337_v46 = vunpack.i.l.bf16 %v2336_v44 }
 0x5ef   : > { %2181 = vmatpush3.bf16.msra.mxu0 %v2178_v39 }
 0x5f0   : > { %v2182_v43 = vpack.c.bf16 %v2333_v41, %v2332_v42  ;;  %v2194_v48 = vpack.c.bf16 %v2338_v45, %v2337_v46 }
 0x5f1   : > { %v2341_v47 = vpop.permute.xlu1 %2340 }
 0x5f2   : > { %2183 = vmatprep.subr.bf16.mxu0 %v2182_v43  ;;  %v2343_v49 = vunpack.i.h.bf16 %v2341_v47  ;;  %v2342_v50 = vunpack.i.l.bf16 %v2341_v47 }
 0x5f3   : > { %2185 = vmatpush3.bf16.msra.mxu0 %v2182_v43 }
 0x5f4   : > { %2187 = vmatprep.subr.bf16.mxu0 %v2834_v15  ;;  %v2198_v51 = vpack.c.bf16 %v2343_v49, %v2342_v50 }
 0x5f7   : > { %2189 = vmatpush3.bf16.msra.mxu0 %v2834_v15 }
 0x5f8   : > { %2191 = vmatprep.subr.bf16.mxu0 %v2839_v18 }
 0x5fb   : > { %2193 = vmatpush3.bf16.msra.mxu0 %v2839_v18 }
 0x5fc   : > { %2195 = vmatprep.subr.bf16.mxu0 %v2194_v48 }
 0x5fe   : > { %v1232_v9 = vpop.permute.xlu0 %1231 }
 0x5ff   : > { %2197 = vmatpush3.bf16.msra.mxu0 %v2194_v48 }
 0x600   : > { %2199 = vmatprep.subr.bf16.mxu0 %v2198_v51 }
 0x602   : > { %v1237_v5 = vpop.permute.xlu1 %1236  ;;  %v1242_v18 = vpop.permute.xlu0 %1241 }
 0x603   : > { %2201 = vmatpush3.bf16.msra.mxu0 %v2198_v51 }
 0x606   : > { %2079 = vmatmul.mubr.msk.f32.vlgmr.msra.gmra.mrb[8].mxu0 %vm381_vm2, %v1788_v52  ;;  %v1247_v10 = vpop.permute.xlu1 %1246  ;;  %v1212_v23 = vpop.permute.xlu0 %1211  ;;  %v1820_v52 = vld [vmem:[%s3050_s4 + $0xa8] sm:$0xff] }
 0x607   : > { %2081 = vmatprep.mubr.msk.f32.mxu0 %vm381_vm2, %v1789_v53  ;;  %v1816_v53 = vld [vmem:[%s3050_s4 + $0x88] sm:$0xff] }
 0x60a   : > { %2082 = vmatmul.mubr.msk.f32.gmra.mrb[10].mxu0 %vm381_vm2, %v1790_v54  ;;  %v1217_v22 = vpop.permute.xlu1 %1216  ;;  %v1222_v29 = vpop.permute.xlu0 %1221  ;;  %v1821_v54 = vld [vmem:[%s3050_s4 + $0xb0] sm:$0xff] }
 0x60b   : > { %2084 = vmatprep.mubr.msk.f32.mxu0 %vm381_vm2, %v1791_v55  ;;  %v1817_v55 = vld [vmem:[%s3050_s4 + $0x90] sm:$0xff] }
 0x60e   : > { %2085 = vmatmul.mubr.msk.f32.gmra.mrb[12].mxu0 %vm381_vm2, %v1792_v56  ;;  %v1227_v27 = vpop.permute.xlu1 %1226  ;;  %v1822_v56 = vld [vmem:[%s3050_s4 + $0xb8] sm:$0xff] }
 0x60f   : > { %2087 = vmatprep.mubr.msk.f32.mxu0 %vm381_vm2, %v1793_v57  ;;  %v1818_v57 = vld [vmem:[%s3050_s4 + $0x98] sm:$0xff] }
 0x612   : > { %2088 = vmatmul.mubr.msk.f32.gmra.mrb[14].mxu0 %vm381_vm2, %v1794_v58  ;;  %v582_v58 = vpop.permute.xlu0 %581  ;;  %v587_v59 = vpop.permute.xlu1 %586 }
 0x613   : > { %2098 = vmatprep.mubr.msk.f32.mxu0 %vm599_vm4, %v1815_v1 }
 0x616   : > { %v592_v60 = vpop.permute.xlu0 %591  ;;  %v597_v61 = vpop.permute.xlu1 %596 }
 0x61a   : > { %v1017_v63 = vpop.permute.xlu0 %1016  ;;  %v1022_v0 = vpop.permute.xlu1 %1021 }
 0x61e   : > { %v1027_v1 = vpop.permute.xlu0 %1026 }
 0x6d9   : > { %v2080_v2 = vpop.f32.mrb[8].mxu0 }
 0x6da   : > { %v1339_v3 = vpop.f32.mrb[9].mxu0  ;;  %v1345_v24 = vadd.f32 %v2080_v2, %v1217_v22  ;;  %v1032_v2 = vpop.permute.xlu1 %1031 }
 0x6db   : > { %v1340_v25 = vadd.f32 %v1339_v3, %v1212_v23  ;;  %v1447_v3 = vpop.permute.xlu0 %1446 }
 0x6dd   : > { %v2083_v4 = vpop.f32.mrb[10].mxu0 }
 0x6de   : > { %v1349_v7 = vpop.f32.mrb[11].mxu0  ;;  %v1355_v30 = vadd.f32 %v2083_v4, %v1227_v27  ;;  %v1452_v4 = vpop.permute.xlu1 %1451 }
 0x6df   : > { %v1350_v32 = vadd.f32 %v1349_v7, %v1222_v29  ;;  %v2217_v7 = vadd.f32 %v1017_v63, %v582_v58 }
 0x6e1   : > { %v2086_v12 = vpop.f32.mrb[12].mxu0 }
 0x6e2   : > { %v1365_v13 = vadd.f32 %v2086_v12, %v1237_v5  ;;  %v1359_v15 = vpop.f32.mrb[13].mxu0  ;;  %v2214_v5 = vadd.f32 %v1022_v0, %v587_v59  ;;  %v1457_v12 = vpop.permute.xlu0 %1456 }
 0x6e3   : > { %v1360_v6 = vadd.f32 %v1359_v15, %v1232_v9  ;;  %v2218_v15 = vadd.f32 %v2217_v7, %v1447_v3 }
 0x6e4   : > { %v1812_v16 = vmul.f32 -1.442695, %v1365_v13  ;;  %v2215_v9 = vadd.f32 %v2214_v5, %v1452_v4  ;;  %v1462_v13 = vpop.permute.xlu1 %1461 }
 0x6e5   : > { %v1811_v17 = vmul.f32 -1.442695, %v1360_v6  ;;  %v2089_v11 = vpop.f32.mrb[14].mxu0 }
 0x6e6   : > { %2392 = vpow2.f32 %v1812_v16  ;;  %v1375_v8 = vadd.f32 %v2089_v11, %v1247_v10  ;;  %v1369_v14 = vpop.f32.mrb[15].mxu0  ;;  %v2220_v16 = vadd.f32 %v1032_v2, %v597_v61 }
 0x6e7   : > { %2394 = vpow2.f32 %v1811_v17  ;;  %v1370_v19 = vadd.f32 %v1369_v14, %v1242_v18 }
 0x6e8   : > { %v1814_v20 = vmul.f32 -1.442695, %v1375_v8  ;;  %v2223_v8 = vadd.f32 %v1027_v1, %v592_v60 }
 0x6e9   : > { %v1813_v21 = vmul.f32 -1.442695, %v1370_v19  ;;  %v2221_v19 = vadd.f32 %v2220_v16, %v1462_v13 }
 0x6ea   : > { %2396 = vpow2.f32 %v1814_v20 }
 0x6eb   : > { %2398 = vpow2.f32 %v1813_v21  ;;  %v2224_v21 = vadd.f32 %v2223_v8, %v1457_v12 }
 0x6ec   : > { %2400 = vtanh.f32 %v1345_v24 }
 0x6ed   : > { %2402 = vtanh.f32 %v1340_v25 }
 0x6f0   : > { %v2393_v26 = vpop.eup %2392 }
 0x6f1   : > { %v2395_v28 = vpop.eup %2394  ;;  %v1395_v31 = vadd.f32 1.0, %v2393_v26 }
 0x6f2   : > { %v1394_v33 = vadd.f32 1.0, %v2395_v28 }
 0x6f3   : > { %2404 = vrcp.f32 %v1395_v31 }
 0x6f4   : > { %v2397_v34 = vpop.eup %2396  ;;  %2406 = vrcp.f32 %v1394_v33 }
 0x6f5   : > { %v2399_v35 = vpop.eup %2398  ;;  %2408 = vtanh.f32 %v1355_v30  ;;  %v1397_v36 = vadd.f32 1.0, %v2397_v34 }
 0x6f6   : > { %2410 = vtanh.f32 %v1350_v32  ;;  %v1396_v37 = vadd.f32 1.0, %v2399_v35  ;;  %v2401_v38 = vpop.eup %2400 }
 0x6f7   : > { %2412 = vrcp.f32 %v1397_v36  ;;  %v2403_v39 = vpop.eup %2402 }
 0x6f8   : > { %2414 = vrcp.f32 %v1396_v37 }
 0x6fd   : > { %v2405_v40 = vpop.eup %2404 }
 0x6fe   : > { %v2407_v41 = vpop.eup %2406  ;;  %v1407_v42 = vmul.f32 %v2405_v40, %v2401_v38 }
 0x6ff   : > { %v2409_v43 = vpop.eup %2408  ;;  %v1406_v44 = vmul.f32 %v2407_v41, %v2403_v39 }
 0x700   : > { %v2411_v45 = vpop.eup %2410 }
 0x701   : > { %v2413_v46 = vpop.eup %2412  ;;  %v2202_v47 = vpack.c.bf16 %v1407_v42, %v1406_v44 }
 0x702   : > { %v2415_v48 = vpop.eup %2414  ;;  %v1409_v49 = vmul.f32 %v2413_v46, %v2409_v43 }
 0x703   : > { %2203 = vmatprep.subr.bf16.mxu0 %v2202_v47  ;;  %2210 = vmatprep.subr.bf16.mxu1 %v2202_v47  ;;  %v1408_v50 = vmul.f32 %v2415_v48, %v2411_v45 }
 0x704   : > { %2205 = vmatpush3.bf16.msra.mxu0 %v2202_v47  ;;  %2212 = vmatpush3.bf16.msra.mxu1 %v2202_v47 }
 0x705   : > { %v2206_v51 = vpack.c.bf16 %v1409_v49, %v1408_v50 }
 0x707   : > { %2207 = vmatprep.subr.bf16.mxu0 %v2206_v51  ;;  %2211 = vmatprep.subr.bf16.mxu1 %v2206_v51 }
 0x708   : > { %2209 = vmatpush3.bf16.msra.mxu0 %v2206_v51  ;;  %2213 = vmatpush3.bf16.msra.mxu1 %v2206_v51 }
 0x70b   : > { %2105 = vmatmul.mubr.msk.f32.vlgmr.msra.gmra.mrb[4].mxu1 %vm599_vm4, %v1820_v52  ;;  %2099 = vmatmul.mubr.msk.f32.vlgmr.msra.gmra.mrb[16].mxu0 %vm599_vm4, %v1816_v53 }
 0x70c   : > { %2107 = vmatprep.mubr.msk.f32.mxu1 %vm599_vm4, %v1821_v54  ;;  %2101 = vmatprep.mubr.msk.f32.mxu0 %vm599_vm4, %v1817_v55 }
 0x70f   : > { %2108 = vmatmul.mubr.msk.f32.gmra.mrb[6].mxu1 %vm599_vm4, %v1822_v56  ;;  %2102 = vmatmul.mubr.msk.f32.gmra.mrb[18].mxu0 %vm599_vm4, %v1818_v57 }
 0x7de   : > { %v2106_v6 = vpop.f32.mrb[4].mxu1  ;;  %v2100_v10 = vpop.f32.mrb[16].mxu0 }
 0x7df   : > { %v2216_v18 = vadd.f32 %v2215_v9, %v2106_v6  ;;  %v1570_v17 = vpop.f32.mrb[5].mxu1  ;;  %v1554_v11 = vpop.f32.mrb[17].mxu0 }
 0x7e0   : > { %v2219_v14 = vadd.f32 %v2218_v15, %v1570_v17 }
 0x7e1   : > { %v1594_v20 = vmul.f32 %v2216_v18, %v2702_v62 }
 0x7e2   : > { %v1593_v22 = vmul.f32 %v2219_v14, %v2702_v62  ;;  %v2109_v23 = vpop.f32.mrb[6].mxu1  ;;  %v2103_v24 = vpop.f32.mrb[18].mxu0 }
 0x7e3   : > { %v2222_v25 = vadd.f32 %v2221_v19, %v2109_v23  ;;  %1603 = vrot.lane.b32.xlu1 %v1594_v20, %s2486_s16  ;;  %v1580_v26 = vpop.f32.mrb[7].mxu1  ;;  %v1562_v27 = vpop.f32.mrb[19].mxu0 }
 0x7e4   : > { %v2225_v28 = vadd.f32 %v2224_v21, %v1580_v26  ;;  %1601 = vrot.lane.b32.xlu0 %v1593_v22, %s2486_s16 }
 0x7e5   : > { %v1596_v29 = vmul.f32 %v2222_v25, %v2702_v62 }
 0x7e6   : > { %v1595_v30 = vmul.f32 %v2225_v28, %v2702_v62 }
 0x7e7   : > { %1607 = vrot.lane.b32.xlu1 %v1596_v29, %s2486_s16 }
 0x7e8   : > { %1605 = vrot.lane.b32.xlu0 %v1595_v30, %s2486_s16  ;;  %s3003_s16 = scalar_lea.hbm %s3052_s6, %s1845_s18 }
 0x855   : > { %v1604_v31 = vpop.permute.xlu1 %1603 }
 0x856   : > { %1615 = vst.msk [vmem:[%s255_s15 + $0x8] sm:$0xff] %vm1613_vm5, %v1604_v31  ;;  %v1602_v32 = vpop.permute.xlu0 %1601 }
 0x857   : > { %1614 = vst.msk [vmem:[%s255_s15] sm:$0xff] %vm1613_vm5, %v1602_v32 }
 0x859   : > { %v1608_v62 = vpop.permute.xlu1 %1607 }
 0x85a   : > { %1617 = vst.msk [vmem:[%s255_s15 + $0x18] sm:$0xff] %vm1613_vm5, %v1608_v62  ;;  %v1606_v33 = vpop.permute.xlu0 %1605 }
 0x85b   : > { %1616 = vst.msk [vmem:[%s255_s15 + $0x10] sm:$0xff] %vm1613_vm5, %v1606_v33 }
 0x85c   : > { %2429 = shalt.err (!%p2426_p3)
}
 0x85d   : > { %s2430_s29 = scalar_lea.hbm %s3003_s16, 512  ;;  %s2434_s12 = scalar_lea.hbm %s3052_s6, 1024 }
 0x85e   : > { %p2431_p4 = scmp.ne.s32.totalorder %s3003_s16, %s2430_s29  ;;  %p2435_p9 = scmp.lt.u32.totalorder %s3003_s16, %s3052_s6 }
 0x85f   : > { %p2436_p10 = scmp.lt.u32.totalorder %s2434_s12, %s2430_s29  ;;  %p2438_p12 = scmp.lt.u32.totalorder %s2430_s29, %s3003_s16 }
 0x860   : > { %p2432_p7 = pnand %p2431_p4, %p2563_p5 }
 0x861   : > { %p2437_p11 = por %p2436_p10, %p2435_p9 }
 0x862   : > { %p2433_p8 = pneg %p2432_p7 }
 0x863   : > { %p2439_p13 = por %p2438_p12, %p2437_p11 }
 0x865   : > { %p2440_p0 = pnand %p2439_p13, %p2433_p8 }
 0x867   : > { %2443 = shalt.err (!%p2440_p0)
}
 0x868   : > { %s2488_s18 = smov 128   ;;  %s2489_s19 = smov 8  }
 0x869   : > { %2234 = dma.vmem_to_hbm [thread:$0]  (%p2563_p5), %s2998_s17, 512, %s3003_s16, %s3005_s26, %s2488_s18, %s2488_s18, %s2489_s19  }
 0x86a PF: > { %p2240_p1 = scmp.ge.s32.totalorder %s2478_s24, 2  ;;  %s1647_s20 = sand.u32 1, %s2466_s21  }
 0x86b   : > { %s1648_s25 = scalar_lea.sflag [#allocation3], %s1647_s20 }
 0x86c   : > { %p2237_p2 = pnand %p2240_p1, %p2567_p6 }
 0x86e   : > { %2461 = dma.done.wait (!%p2237_p2), %s1648_s25, 512  }
 0x86f   : > { %2463 = vsyncadd (!%p2237_p2), %s1648_s25, 4294966784  ;;  %p16_p3 = scmp.ge.s32.totalorder %s2550_s27, 4   ;;  %s3055_s21 = smov %s2470_s22 }
 0x870   : > { %s3056_s22 = smov %s2474_s23  ;;  %s3057_s23 = smov %s2561_s30 }
 0x871   : > { %s3058_s24 = smov %s2550_s27  ;;  %18 = sbr.rel (!%p16_p3) target bundleno = 3 (0x3), region = 90 }
 0x878   :  { %1653 = vsyncpa [#allocation3], 1 }
 0x879   :  { %1655 = vsyncpa [#allocation3 + $0x1], 1 }

</bundles_post_ra>
